<compile_context>
chip_gen: v7x
topology: tpu7x:2x2x1
jax: 0.10.0
libtpu: 0.0.40
codegen_flags: <defaults>
</compile_context>

<pallas_src>
import functools

import jax
import jax.numpy as jnp
from jax import lax
from jax.experimental import pallas as pl
from jax.experimental.pallas import tpu as pltpu

HIDDEN = 32
IN_DIM = 1
OUT_DIM = 1
_SLAB_LANES = 128              # lane-dense packing width of the parameter slab
_CHUNK = 512                   # lanes kept vreg-resident per inner-loop step
_DEFAULT_BLOCK_BATCH = 2048    # default lanes per grid step (amortizes ~600-cycle step cost)

# Column layout inside each (HIDDEN, 128) slab (one slab per mu / rho / eps):
#   cols 0:32 -> W2 (out, in) = (32, 32)
#   col  32   -> W1[:, 0] (32,)
#   col  33   -> b1       (32,)
#   col  34   -> b2       (32,)
#   col  35   -> W3[0, :] (32,)   (transposed last-layer weight)
#   [0,  36]  -> b3 scalar
_COL_W2_LO, _COL_W2_HI = 0, 32
_COL_W1, _COL_B1, _COL_B2, _COL_W3, _COL_B3 = 32, 33, 34, 35, 36


def _stable_softplus(v):
    # max(v, 0) + log1p(exp(-|v|)) == log1p(exp(v)) without overflow.
    return jnp.maximum(v, 0.0) + jnp.log1p(jnp.exp(-jnp.abs(v)))


def _round_up(n, m):
    return ((n + m - 1) // m) * m


def _cdiv(a, b):
    return (a + b - 1) // b


def bayesian_mlp_kernel(params_ref, x_ref, o_ref, *, chunk, num_chunks):
    # params_ref: (3, HIDDEN, 128) = (mu, rho, eps) slabs, VMEM-resident across the grid.
    # x_ref:      (1, TB) batch tile on the lane axis (TB = chunk * num_chunks).
    # o_ref:      (1, TB) lane-dense output tile.
    mu = params_ref[0]
    rho = params_ref[1]
    eps = params_ref[2]

    # Reparameterization sample of every parameter in one fused elementwise pass
    # (VPU + EUP, ~4 vregs).  Recomputed per tile so the batch axis stays truly "parallel".
    sampled = mu + _stable_softplus(rho) * eps            # (HIDDEN, 128)

    # ---- Hoisted above the chunk loop: sub-lane slices, bf16 cast, lane broadcasts. ----
    w2_bf = sampled[:, _COL_W2_LO:_COL_W2_HI].astype(jnp.bfloat16)          # (32, 32)
    w1_b = jnp.broadcast_to(sampled[:, _COL_W1:_COL_W1 + 1], (HIDDEN, chunk))
    b1_b = jnp.broadcast_to(sampled[:, _COL_B1:_COL_B1 + 1], (HIDDEN, chunk))
    b2_b = jnp.broadcast_to(sampled[:, _COL_B2:_COL_B2 + 1], (HIDDEN, chunk))
    w3_b = jnp.broadcast_to(sampled[:, _COL_W3:_COL_W3 + 1], (HIDDEN, chunk))
    b3 = sampled[0:1, _COL_B3:_COL_B3 + 1]                                  # (1, 1)

    def body(c, carry):
        start = pl.multiple_of(c * chunk, 128)
        x_c = x_ref[:, pl.ds(start, chunk)]               # (1, chunk), lane-dense load

        # Layer 1: K=1 contraction -> VPU broadcast outer product (no MXU).
        h = jnp.maximum(w1_b * x_c + b1_b, 0.0)           # (32, chunk)
        # Layer 2: (32,32) @ (32,chunk) on the MXU; bf16 inputs, f32 accumulation.
        h = jnp.dot(w2_bf, h.astype(jnp.bfloat16),
                    preferred_element_type=jnp.float32) + b2_b
        h = jnp.maximum(h, 0.0)
        # Layer 3: N=1 contraction -> VPU multiply + cross-sublane (XLU) reduction.
        o_ref[:, pl.ds(start, chunk)] = (
            jnp.sum(w3_b * h, axis=0, keepdims=True) + b3)
        return carry

    # Vreg-resident chunk loop: intermediates stay in ~4-16 live vregs per step; no spill.
    lax.fori_loop(0, num_chunks, body, 0, unroll=True)


def _select_tile(batch, block_batch):
    """Pick (tile_lanes, padded_lanes): 128-aligned, minimal over-padding, >=2 tiles at
    large batch (feeds both v7x TensorCores), single tile when the batch is small."""
    padded128 = _round_up(batch, 128)
    bb = max(128, _round_up(block_batch, 128))
    if padded128 <= bb:
        return padded128, padded128                       # one grid step, no waste
    ntiles = _cdiv(padded128, bb)
    tb = _round_up(_cdiv(padded128, ntiles), 128)         # balanced tiles, <128*ntiles waste
    return tb, tb * ntiles


def bayesian_network_forward(x, packed_params, block_batch=_DEFAULT_BLOCK_BATCH):
    """x: (B, 1) float32 -> (B, 1) float32."""
    batch = x.shape[0]
    tb, padded = _select_tile(batch, block_batch)
    chunk = next(c for c in (_CHUNK, 256, 128) if tb % c == 0)
    num_chunks = tb // chunk

    x_t = x.reshape(1, batch)                             # batch on the lane axis
    if padded != batch:
        x_t = jnp.pad(x_t, ((0, 0), (0, padded - batch)))

    kernel = functools.partial(bayesian_mlp_kernel, chunk=chunk, num_chunks=num_chunks)
    out_t = pl.pallas_call(
        kernel,
        out_shape=jax.ShapeDtypeStruct((1, padded), jnp.float32),
        grid_spec=pltpu.PrefetchScalarGridSpec(
            num_scalar_prefetch=0,
            grid=(padded // tb,),
            in_specs=[
                # Single packed parameter slab; constant index_map -> VMEM-resident.
                pl.BlockSpec((3, HIDDEN, _SLAB_LANES), lambda i: (0, 0, 0)),
                # Activation tile: batch on lanes (lane-dense loads).
                pl.BlockSpec((1, tb), lambda i: (0, i)),
            ],
            out_specs=pl.BlockSpec((1, tb), lambda i: (0, i)),
        ),
        compiler_params=pltpu.CompilerParams(
            dimension_semantics=("parallel",),  # 2nd TensorCore on v7x; harmless on v5e/v6e
        ),
    )(packed_params, x_t)
    return out_t[:, :batch].reshape(batch, OUT_DIM)


def make_params(key):
    """Deterministic synthetic PyTorch-layout parameters + noise for 3 Bayesian layers."""
    dims = [(IN_DIM, HIDDEN), (HIDDEN, HIDDEN), (HIDDEN, OUT_DIM)]
    params = []
    for (din, dout) in dims:
        key, k_wmu, k_wrho, k_weps, k_bmu, k_brho, k_beps = jax.random.split(key, 7)
        layer = dict(
            w_mu=0.1 * jax.random.normal(k_wmu, (dout, din), jnp.float32),
            w_rho=jnp.full((dout, din), -3.0, jnp.float32)
                  + 0.1 * jax.random.normal(k_wrho, (dout, din), jnp.float32),
            w_eps=jax.random.normal(k_weps, (dout, din), jnp.float32),
            b_mu=0.1 * jax.random.normal(k_bmu, (dout,), jnp.float32),
            b_rho=jnp.full((dout,), -3.0, jnp.float32)
                  + 0.1 * jax.random.normal(k_brho, (dout,), jnp.float32),
            b_eps=jax.random.normal(k_beps, (dout,), jnp.float32),
        )
        params.append(layer)
    return params


def pack_params(params):
    """Pack 18 parameter tensors into one lane-dense (3, HIDDEN, 128) f32 slab."""
    def build(comp):
        w1 = params[0]['w_' + comp]   # (32, 1)
        b1 = params[0]['b_' + comp]   # (32,)
        w2 = params[1]['w_' + comp]   # (32, 32)
        b2 = params[1]['b_' + comp]   # (32,)
        w3 = params[2]['w_' + comp]   # (1, 32)
        b3 = params[2]['b_' + comp]   # (1,)
        slab = jnp.zeros((HIDDEN, _SLAB_LANES), jnp.float32)
        slab = slab.at[:, _COL_W2_LO:_COL_W2_HI].set(w2)
        slab = slab.at[:, _COL_W1].set(w1[:, 0])
        slab = slab.at[:, _COL_B1].set(b1)
        slab = slab.at[:, _COL_B2].set(b2)
        slab = slab.at[:, _COL_W3].set(w3[0, :])
        slab = slab.at[0, _COL_B3].set(b3[0])
        return slab

    return jnp.stack([build('mu'), build('rho'), build('eps')], axis=0)


def reference_forward(x, params):
    """Pure-JAX f32 reference mirroring the PyTorch forward (y = x @ W.T + b)."""
    h = x
    for i, layer in enumerate(params):
        w = layer['w_mu'] + _stable_softplus(layer['w_rho']) * layer['w_eps']
        b = layer['b_mu'] + _stable_softplus(layer['b_rho']) * layer['b_eps']
        h = h @ w.T + b
        if i < 2:
            h = jnp.maximum(h, 0.0)
    return h


if __name__ == "__main__":
    key = jax.random.PRNGKey(0)
    key, kx_small, kx_large = jax.random.split(key, 3)
    params = make_params(key)
    packed = pack_params(params)

    # Tolerance is loosened vs. pure-f32 because the layer-2 matmul inputs are bf16
    # (MXU-native); the error is far below the Bayesian sampling noise.
    ATOL = RTOL = 3e-2

    # Small shape: single grid step, single 128-lane chunk.
    batch_small = 8
    x_small = jax.random.normal(kx_small, (batch_small, IN_DIM), jnp.float32)
    out_small = jax.block_until_ready(bayesian_network_forward(x_small, packed))
    ref_small = reference_forward(x_small, params)
    assert out_small.shape == (batch_small, OUT_DIM)
    assert jnp.allclose(out_small, ref_small, atol=ATOL, rtol=RTOL), (out_small[:4], ref_small[:4])

    # Larger batch: exercises 2 parallel grid tiles x 3 vreg-resident 512-lane chunks + padding.
    batch_large = 3000
    x_large = jax.random.normal(kx_large, (batch_large, IN_DIM), jnp.float32)
    out_large = jax.block_until_ready(bayesian_network_forward(x_large, packed))
    ref_large = reference_forward(x_large, params)
    assert out_large.shape == (batch_large, OUT_DIM)
    assert jnp.allclose(out_large, ref_large, atol=ATOL, rtol=RTOL), (out_large[:4], ref_large[:4])

    print("KERNEL_OK")
</pallas_src>

<mosaic_0001>
module attributes {stable_mosaic.version = 11 : i64} {
  func.func @bayesian_mlp_kernel(%arg0: i32, %arg1: memref<3x32x128xf32, #tpu.memory_space<vmem>>, %arg2: memref<1x128xf32, #tpu.memory_space<vmem>>, %arg3: memref<1x128xf32, #tpu.memory_space<vmem>>) attributes {dimension_semantics = [#tpu.dimension_semantics<parallel>], iteration_bounds = array<i64: 1>, scalar_prefetch = 0 : i64, scratch_operands = 0 : i64, tpu.core_type = #tpu.core_type<tc>, window_params = [{pipeline_mode = #tpu.pipeline_mode<synchronous>, transform_indices = @transform_0, window_bounds = array<i64: 3, 32, 128>}, {transform_indices = @transform_1, window_bounds = array<i64: 1, 128>}, {transform_indices = @transform_2, window_bounds = array<i64: 1, 128>}]} {
    %c0 = arith.constant 0 : index
    %c0_0 = arith.constant 0 : index
    %c0_1 = arith.constant 0 : index
    %0 = vector.load %arg1[%c0, %c0_0, %c0_1] : memref<3x32x128xf32, #tpu.memory_space<vmem>>, vector<1x32x128xf32>
    %1 = vector.shape_cast %0 : vector<1x32x128xf32> to vector<32x128xf32>
    %c1 = arith.constant 1 : index
    %c0_2 = arith.constant 0 : index
    %c0_3 = arith.constant 0 : index
    %2 = vector.load %arg1[%c1, %c0_2, %c0_3] : memref<3x32x128xf32, #tpu.memory_space<vmem>>, vector<1x32x128xf32>
    %3 = vector.shape_cast %2 : vector<1x32x128xf32> to vector<32x128xf32>
    %c2 = arith.constant 2 : index
    %c0_4 = arith.constant 0 : index
    %c0_5 = arith.constant 0 : index
    %4 = vector.load %arg1[%c2, %c0_4, %c0_5] : memref<3x32x128xf32, #tpu.memory_space<vmem>>, vector<1x32x128xf32>
    %5 = vector.shape_cast %4 : vector<1x32x128xf32> to vector<32x128xf32>
    %cst = arith.constant 0.000000e+00 : f32
    %6 = vector.broadcast %cst : f32 to vector<32x128xf32>
    %7 = arith.maximumf %3, %6 : vector<32x128xf32>
    %8 = math.absf %3 : vector<32x128xf32>
    %cst_6 = arith.constant 0.000000e+00 : f32
    %9 = vector.broadcast %cst_6 : f32 to vector<32x128xf32>
    %10 = arith.subf %9, %8 : vector<32x128xf32>
    %11 = math.exp %10 : vector<32x128xf32>
    %12 = math.log1p %11 : vector<32x128xf32>
    %13 = arith.addf %7, %12 : vector<32x128xf32>
    %14 = arith.mulf %13, %5 : vector<32x128xf32>
    %15 = arith.addf %1, %14 : vector<32x128xf32>
    %16 = vector.extract_strided_slice %15 {offsets = [0, 0], sizes = [32, 32], strides = [1, 1]} : vector<32x128xf32> to vector<32x32xf32>
    %17 = arith.truncf %16 : vector<32x32xf32> to vector<32x32xbf16>
    %18 = vector.extract_strided_slice %15 {offsets = [0, 32], sizes = [32, 1], strides = [1, 1]} : vector<32x128xf32> to vector<32x1xf32>
    %19 = vector.shape_cast %18 : vector<32x1xf32> to vector<32x1xf32>
    %20 = vector.broadcast %19 : vector<32x1xf32> to vector<32x128xf32>
    %21 = vector.extract_strided_slice %15 {offsets = [0, 33], sizes = [32, 1], strides = [1, 1]} : vector<32x128xf32> to vector<32x1xf32>
    %22 = vector.shape_cast %21 : vector<32x1xf32> to vector<32x1xf32>
    %23 = vector.broadcast %22 : vector<32x1xf32> to vector<32x128xf32>
    %24 = vector.extract_strided_slice %15 {offsets = [0, 34], sizes = [32, 1], strides = [1, 1]} : vector<32x128xf32> to vector<32x1xf32>
    %25 = vector.shape_cast %24 : vector<32x1xf32> to vector<32x1xf32>
    %26 = vector.broadcast %25 : vector<32x1xf32> to vector<32x128xf32>
    %27 = vector.extract_strided_slice %15 {offsets = [0, 35], sizes = [32, 1], strides = [1, 1]} : vector<32x128xf32> to vector<32x1xf32>
    %28 = vector.shape_cast %27 : vector<32x1xf32> to vector<32x1xf32>
    %29 = vector.broadcast %28 : vector<32x1xf32> to vector<32x128xf32>
    %30 = vector.extract_strided_slice %15 {offsets = [0, 36], sizes = [1, 1], strides = [1, 1]} : vector<32x128xf32> to vector<1x1xf32>
    %c0_i32 = arith.constant 0 : i32
    %c128_i32 = arith.constant 128 : i32
    %31 = arith.muli %c0_i32, %c128_i32 : i32
    %32 = tpu.assume_multiple %31, 128 : i32
    %c0_7 = arith.constant 0 : index
    %33 = arith.index_cast %32 : i32 to index
    %34 = vector.load %arg2[%c0_7, %33] : memref<1x128xf32, #tpu.memory_space<vmem>>, vector<1x128xf32>
    %35 = vector.broadcast %34 : vector<1x128xf32> to vector<32x128xf32>
    %36 = arith.mulf %20, %35 : vector<32x128xf32>
    %37 = arith.addf %36, %23 : vector<32x128xf32>
    %cst_8 = arith.constant 0.000000e+00 : f32
    %38 = vector.broadcast %cst_8 : f32 to vector<32x128xf32>
    %39 = arith.maximumf %37, %38 : vector<32x128xf32>
    %40 = arith.truncf %39 : vector<32x128xf32> to vector<32x128xbf16>
    %cst_9 = arith.constant dense<0.000000e+00> : vector<32x128xf32>
    %41 = tpu.matmul %17, %40, %cst_9 {dimension_numbers = #tpu.dot_dimension_numbers<[1], [0], [0], [1], [0, 0, 1, 1], [], []>} : vector<32x32xbf16>, vector<32x128xbf16>, vector<32x128xf32> -> vector<32x128xf32>
    %42 = arith.addf %41, %26 : vector<32x128xf32>
    %cst_10 = arith.constant 0.000000e+00 : f32
    %43 = vector.broadcast %cst_10 : f32 to vector<32x128xf32>
    %44 = arith.maximumf %42, %43 : vector<32x128xf32>
    %45 = arith.mulf %29, %44 : vector<32x128xf32>
    %cst_11 = arith.constant dense<0.000000e+00> : vector<128xf32>
    %46 = vector.multi_reduction <add>, %45, %cst_11 [0] : vector<32x128xf32> to vector<128xf32>
    %47 = vector.shape_cast %46 : vector<128xf32> to vector<1x128xf32>
    %48 = vector.broadcast %30 : vector<1x1xf32> to vector<1x128xf32>
    %49 = arith.addf %47, %48 : vector<1x128xf32>
    %c0_12 = arith.constant 0 : index
    %50 = arith.index_cast %32 : i32 to index
    %51 = vector.load %arg3[%c0_12, %50] : memref<1x128xf32, #tpu.memory_space<vmem>>, vector<1x128xf32>
    tpu.vector_store %arg3[%c0_12, %50], %49 {strides = array<i32>} : memref<1x128xf32, #tpu.memory_space<vmem>>, vector<1x128xf32>,
    %c1_i32 = arith.constant 1 : i32
    return
  }
  func.func @transform_0(%arg0: i32) -> (i32, i32, i32) {
    %c0_i32 = arith.constant 0 : i32
    %c0_i32_0 = arith.constant 0 : i32
    %c0_i32_1 = arith.constant 0 : i32
    %c0_i32_2 = arith.constant 0 : i32
    return %c0_i32, %c0_i32_0, %c0_i32_1 : i32, i32, i32
  }
  func.func @transform_1(%arg0: i32) -> (i32, i32) {
    %c0_i32 = arith.constant 0 : i32
    %c0_i32_0 = arith.constant 0 : i32
    return %c0_i32, %arg0 : i32, i32
  }
  func.func @transform_2(%arg0: i32) -> (i32, i32) {
    %c0_i32 = arith.constant 0 : i32
    %c0_i32_0 = arith.constant 0 : i32
    return %c0_i32, %arg0 : i32, i32
  }
}

</mosaic_0001>

<bundles_post_ra>
// kernel: tpu_custom_call.1
= control target key start
LH: loop header
LB: loop body
LE: loop exit
PB: predicated region body
PF: predicated region fallthrough
CT: control target
= control target key end

     0   :  { %7 = vsyncpa [#allocation3], 0  ;;  %s485_s0 = inlined_call_operand.hbm [shape: f32[3,32,128], index: 0, kind: input, shape index: {}]   ;;  %s486_s1 = inlined_call_operand.vmem [shape: f32[1,128], index: 1, kind: input, shape index: {}]   ;;  %s487_s2 = inlined_call_operand.hbm [shape: f32[1,128], index: 2, kind: output, shape index: {}]  }
   0x1   :  { %8 = vsyncpa [#allocation4], 0  ;;  %s393_s9 = smov [#allocation2]   ;;  %s345_s13 = scalar_lea.hbm %s485_s0, 1536 }
   0x2   :  { %s14_s10 = sshll.u32 %s393_s9, 4  ;;  %p346_p0 = scmp.ne.s32.totalorder %s485_s0, %s345_s13  ;;  %s15_s10 = int_to_ptr.vmem [resolvable:$true] %s14_s10 }
   0x3   :  { %p349_p1 = scmp.lt.u32.totalorder %s345_s13, %s485_s0 }
   0x5   :  { %p351_p2 = pnand %p349_p1, %p346_p0 }
   0x7   :  { %354 = shalt.err (!%p351_p2)
}
   0x8   :  { %s355_s18 = scalar_lea.vmem %s15_s10, 1536  ;;  %p360_p4 = scmp.lt.s32.totalorder %s15_s10, %s15_s10 }
   0x9   :  { %p356_p3 = scmp.ne.s32.totalorder %s15_s10, %s355_s18  ;;  %p361_p5 = scmp.lt.s32.totalorder %s355_s18, %s355_s18 }
   0xb   :  { %p362_p6 = por %p361_p5, %p360_p4 }
   0xd   :  { %p363_p7 = pnand %p362_p6, %p356_p3 }
   0xf   :  { %366 = shalt.err (!%p363_p7)
}
  0x10   :  { %s394_s19 = smov 128   ;;  %s395_s20 = smov 8  }
  0x11   :  { %20 = dma.hbm_to_vmem [thread:$0]  %s485_s0, 1536, %s15_s10, [#allocation3], %s394_s19, %s394_s19, %s395_s20  }
  0x12   :  { %389 = dma.done.wait [#allocation3], 1536  }
  0x13   :  { %390 = vsyncadd [#allocation3], 4294965760  ;;  %v396_v0 = vmov 33   ;;  %v397_v1 = vmov 32   ;;  %v431_v2 = vld [vmem:[#allocation2 + $0x20] sm:$0xff]  ;;  %v434_v4 = vld [vmem:[#allocation2 + $0x28] sm:$0xff] }
  0x14   :  { %319 = vset.pattern.permute.xlu1 %v396_v0  ;;  %318 = vset.pattern.permute.xlu0 %v397_v1  ;;  %v45_v3 = vand.u32 2147483647, %v431_v2  ;;  %v46_v5 = vand.u32 2147483647, %v434_v4  ;;  %v437_v6 = vld [vmem:[#allocation2 + $0x30] sm:$0xff]  ;;  %v440_v9 = vld [vmem:[#allocation2 + $0x38] sm:$0xff] }
  0x15   :  { %v47_v8 = vand.u32 2147483647, %v437_v6  ;;  %v48_v11 = vand.u32 2147483647, %v440_v9  ;;  %v41_v39 = vmax.f32 %v431_v2, 0.0  ;;  %v42_v45 = vmax.f32 %v434_v4, 0.0 }
  0x16   :  { %v49_v7 = vsub.f32 0.0, %v45_v3  ;;  %v50_v10 = vsub.f32 0.0, %v46_v5  ;;  %v43_v50 = vmax.f32 %v437_v6, 0.0  ;;  %v37_v52 = vld [vmem:[#allocation2 + $0x40] sm:$0xff]  ;;  %v38_v58 = vld [vmem:[#allocation2 + $0x48] sm:$0xff]  ;;  %v44_v60 = vmax.f32 %v440_v9, 0.0 }
  0x17   :  { %v51_v13 = vsub.f32 0.0, %v47_v8  ;;  %v52_v15 = vsub.f32 0.0, %v48_v11  ;;  %v27_v61 = vld [vmem:[#allocation2] sm:$0xff]  ;;  %v28_v5 = vld [vmem:[#allocation2 + $0x8] sm:$0xff]  ;;  %v40_v11 = vld [vmem:[#allocation2 + $0x58] sm:$0xff]  ;;  %vm200_vm4 = vcmask 261120  }
  0x18   :  { %v53_v12 = vmul.f32 1.442695, %v49_v7  ;;  %v55_v14 = vmul.f32 1.442695, %v50_v10  ;;  %v39_v7 = vld [vmem:[#allocation2 + $0x50] sm:$0xff] }
  0x19   :  { %v57_v16 = vmul.f32 1.442695, %v51_v13  ;;  %v59_v17 = vmul.f32 1.442695, %v52_v15 }
  0x1a   :  { %329 = vpow2.f32 %v53_v12 }
  0x1b   :  { %331 = vpow2.f32 %v55_v14  ;;  %v29_v14 = vld [vmem:[#allocation2 + $0x10] sm:$0xff] }
  0x1c   :  { %333 = vpow2.f32 %v57_v16  ;;  %v30_v16 = vld [vmem:[#allocation2 + $0x18] sm:$0xff] }
  0x1d   :  { %335 = vpow2.f32 %v59_v17 }
  0x24   :  { %v330_v18 = vpop.eup %329 }
  0x25   :  { %v332_v19 = vpop.eup %331  ;;  %v61_v20 = vadd.f32 1.0, %v330_v18  ;;  %v64_v25 = vmul.f32 -0.5, %v330_v18  ;;  %v67_v31 = vand.u32 2147483647, %v330_v18 }
  0x26   :  { %v334_v21 = vpop.eup %333  ;;  %v70_v22 = vadd.f32 1.0, %v332_v19  ;;  %v73_v26 = vmul.f32 -0.5, %v332_v19  ;;  %v76_v33 = vand.u32 2147483647, %v332_v19 }
  0x27   :  { %v336_v23 = vpop.eup %335  ;;  %337 = vlog2.f32 %v61_v20  ;;  %v79_v24 = vadd.f32 1.0, %v334_v21  ;;  %v82_v28 = vmul.f32 -0.5, %v334_v21  ;;  %v65_v29 = vadd.f32 1.0, %v64_v25 }
  0x28   :  { %339 = vlog2.f32 %v70_v22  ;;  %v88_v27 = vadd.f32 1.0, %v336_v23  ;;  %v91_v30 = vmul.f32 -0.5, %v336_v23  ;;  %v74_v32 = vadd.f32 1.0, %v73_v26  ;;  %v294_v22 = vld [vmem:[%s486_s1] ss:$0 sm:$0xff]  ;;  %s401_s1 = smov [#allocation5]  }
  0x29   :  { %341 = vlog2.f32 %v79_v24  ;;  %v83_v34 = vadd.f32 1.0, %v82_v28  ;;  %v85_v35 = vand.u32 2147483647, %v334_v21  ;;  %v66_v36 = vmul.f32 %v330_v18, %v65_v29  ;;  %s285_s24 = sshll.u32 %s401_s1, 4  ;;  %s286_s24 = int_to_ptr.vmem [resolvable:$true] %s285_s24 }
  0x2a   :  { %343 = vlog2.f32 %v88_v27  ;;  %v92_v37 = vadd.f32 1.0, %v91_v30  ;;  %vm444_vm0 = vcmp.lt.f32.partialorder %v67_v31, 0.0004427343  ;;  %v75_v41 = vmul.f32 %v332_v19, %v74_v32  ;;  %s367_s25 = scalar_lea.vmem %s286_s24, 16  ;;  %s371_s26 = scalar_lea.vmem %s286_s24, 32 }
  0x2b   :  { %v94_v42 = vand.u32 2147483647, %v336_v23  ;;  %vm449_vm1 = vcmp.lt.f32.partialorder %v76_v33, 0.0004427343  ;;  %v84_v47 = vmul.f32 %v334_v21, %v83_v34  ;;  %vm454_vm2 = vcmp.lt.f32.partialorder %v85_v35, 0.0004427343  ;;  %p368_p8 = scmp.ne.s32.totalorder %s286_s24, %s367_s25  ;;  %p372_p9 = scmp.lt.s32.totalorder %s286_s24, %s286_s24 }
  0x2c   :  { %v93_v55 = vmul.f32 %v336_v23, %v92_v37  ;;  %v398_v21 = vmov 34   ;;  %p373_p10 = scmp.lt.s32.totalorder %s371_s26, %s367_s25 }
  0x2d   :  { %vm95_vm3 = vcmp.lt.f32.partialorder %v94_v42, 0.0004427343 }
  0x2e   :  { %p374_p11 = por %p373_p10, %p372_p9 }
  0x30   :  { %p375_p12 = pnand %p374_p11, %p368_p8 }
  0x31   :  { %v338_v38 = vpop.eup %337 }
  0x32   :  { %v340_v43 = vpop.eup %339  ;;  %v63_v44 = vmul.f32 0.6931472, %v338_v38 }
  0x33   :  { %v342_v48 = vpop.eup %341  ;;  %v72_v49 = vmul.f32 0.6931472, %v340_v43 }
  0x34   :  { %v69_v53 = vsel %vm444_vm0, %v66_v36, %v63_v44  ;;  %v81_v54 = vmul.f32 0.6931472, %v342_v48  ;;  %v344_v56 = vpop.eup %343 }
  0x35   :  { %v97_v57 = vadd.f32 %v69_v53, %v41_v39  ;;  %v78_v59 = vsel %vm449_vm1, %v75_v41, %v72_v49  ;;  %v90_v2 = vmul.f32 0.6931472, %v344_v56 }
  0x36   :  { %v98_v62 = vadd.f32 %v78_v59, %v42_v45  ;;  %v87_v63 = vsel %vm454_vm2, %v84_v47, %v81_v54 }
  0x37   :  { %v101_v3 = vmul.f32 %v97_v57, %v37_v52  ;;  %v99_v4 = vadd.f32 %v87_v63, %v43_v50  ;;  %v96_v8 = vsel %vm95_vm3, %v93_v55, %v90_v2 }
  0x38   :  { %v102_v6 = vmul.f32 %v98_v62, %v38_v58  ;;  %v100_v12 = vadd.f32 %v96_v8, %v44_v60 }
  0x39   :  { %v105_v10 = vadd.f32 %v101_v3, %v27_v61  ;;  %v103_v9 = vmul.f32 %v99_v4, %v39_v7 }
  0x3a   :  { %v106_v13 = vadd.f32 %v102_v6, %v28_v5  ;;  %v104_v15 = vmul.f32 %v100_v12, %v40_v11 }
  0x3b   :  { %132 = vperm.xlu1 %319, %v105_v10   ;;  %113 = vperm.xlu0 %318, %v105_v10   ;;  %v107_v17 = vadd.f32 %v103_v9, %v29_v14 }
  0x3c   :  { %v108_v18 = vadd.f32 %v104_v15, %v30_v16  ;;  %v109_v19 = vpack.c.bf16 %v106_v13, %v105_v10 }
  0x3e   :  { %v110_v20 = vpack.c.bf16 %v108_v18, %v107_v17  ;;  %305 = vmatprep.mubr.msk.bf16.mxu0 %vm200_vm4, %v109_v19 }
  0x3f   :  { %136 = vperm.xlu1 %319, %v106_v13   ;;  %118 = vperm.xlu0 %318, %v106_v13  }
  0x43   :  { %320 = vset.pattern.permute.xlu1 %v397_v1  ;;  %123 = vperm.xlu0 %318, %v107_v17   ;;  %v399_v1 = vmov 35  }
  0x44   :  { %128 = vperm.xlu1 %320, %v108_v18  }
  0x47   :  { %321 = vset.pattern.permute.xlu0 %v396_v0 }
  0x48   :  { %322 = vset.pattern.permute.xlu1 %v396_v0  ;;  %140 = vperm.xlu0 %321, %v107_v17   ;;  %v400_v0 = vmov 36  }
  0x49   :  { %144 = vperm.xlu1 %322, %v108_v18  }
  0x4c   :  { %324 = vset.pattern.permute.xlu0 %v398_v21 }
  0x4d   :  { %323 = vset.pattern.permute.xlu1 %v398_v21  ;;  %152 = vperm.xlu0 %324, %v106_v13  }
  0x4e   :  { %148 = vperm.xlu1 %323, %v105_v10  }
  0x51   :  { %325 = vset.pattern.permute.xlu0 %v399_v1 }
  0x52   :  { %156 = vperm.xlu1 %323, %v107_v17   ;;  %164 = vperm.xlu0 %325, %v105_v10  }
  0x56   :  { %160 = vperm.xlu1 %323, %v108_v18   ;;  %176 = vperm.xlu0 %325, %v108_v18  }
  0x5a   :  { %326 = vset.pattern.permute.xlu1 %v399_v1  ;;  %328 = vset.pattern.permute.xlu0 %v400_v0 }
  0x5b   :  { %168 = vperm.xlu1 %326, %v106_v13  }
  0x5f   :  { %172 = vperm.xlu1 %326, %v107_v17  }
  0x63   :  { %327 = vset.pattern.permute.xlu1 %v400_v0 }
  0x64   :  { %274 = vperm.xlu1 %327, %v105_v10  }
  0xba   :  { %v133_v23 = vpop.permute.xlu1 %132  ;;  %v114_v24 = vpop.permute.xlu0 %113 }
  0xbb   :  { %v186_v25 = vmul.f32 %v294_v22, %v114_v24 }
  0xbd   :  { %v190_v28 = vadd.f32 %v186_v25, %v133_v23 }
  0xbe   :  { %v137_v26 = vpop.permute.xlu1 %136  ;;  %v119_v27 = vpop.permute.xlu0 %118 }
  0xbf   :  { %v187_v29 = vmul.f32 %v294_v22, %v119_v27  ;;  %v194_v32 = vmax.f32 %v190_v28, 0.0 }
  0xc1   :  { %v191_v30 = vadd.f32 %v187_v29, %v137_v26 }
  0xc2   :  { %v124_v31 = vpop.permute.xlu0 %123 }
  0xc3   :  { %v195_v33 = vmax.f32 %v191_v30, 0.0  ;;  %v129_v34 = vpop.permute.xlu1 %128  ;;  %v188_v36 = vmul.f32 %v294_v22, %v124_v31 }
  0xc4   :  { %v189_v37 = vmul.f32 %v294_v22, %v129_v34 }
  0xc5   :  { %v198_v35 = vpack.c.bf16 %v195_v33, %v194_v32 }
  0xc7   :  { %301 = vmatprep.subr.bf16.mxu0 %v198_v35  ;;  %v141_v38 = vpop.permute.xlu0 %140 }
  0xc8   :  { %v192_v39 = vadd.f32 %v188_v36, %v141_v38  ;;  %v145_v40 = vpop.permute.xlu1 %144  ;;  %302 = vmatpush3.bf16.msra.mxu0 %v198_v35 }
  0xc9   :  { %v193_v41 = vadd.f32 %v189_v37, %v145_v40 }
  0xca   :  { %v196_v42 = vmax.f32 %v192_v39, 0.0 }
  0xcb   :  { %v197_v43 = vmax.f32 %v193_v41, 0.0 }
  0xcc   :  { %v153_v48 = vpop.permute.xlu0 %152 }
  0xcd   :  { %v199_v44 = vpack.c.bf16 %v197_v43, %v196_v42  ;;  %v149_v45 = vpop.permute.xlu1 %148 }
  0xcf   :  { %303 = vmatprep.subr.bf16.mxu0 %v199_v44 }
  0xd0   :  { %304 = vmatpush3.bf16.msra.mxu0 %v199_v44 }
  0xd1   :  { %v157_v46 = vpop.permute.xlu1 %156  ;;  %v165_v55 = vpop.permute.xlu0 %164 }
  0xd3   :  { %306 = vmatmul.mubr.msk.bf16.vlgmr.msra.gmra.mrb[0].mxu0 %vm200_vm4, %v110_v20 }
  0xd5   :  { %v161_v47 = vpop.permute.xlu1 %160  ;;  %v177_v4 = vpop.permute.xlu0 %176 }
  0xda   :  { %v169_v50 = vpop.permute.xlu1 %168 }
  0xde   :  { %v173_v62 = vpop.permute.xlu1 %172 }
  0xe3   :  { %v275_v15 = vpop.permute.xlu1 %274 }
 0x1a6   :  { %v307_v49 = vpop.f32.mrb[0].mxu0 }
 0x1a7   :  { %v241_v51 = vpop.f32.mrb[1].mxu0  ;;  %v250_v52 = vadd.f32 %v307_v49, %v157_v46 }
 0x1a8   :  { %v242_v53 = vadd.f32 %v241_v51, %v149_v45  ;;  %v308_v54 = vpop.f32.mrb[2].mxu0 }
 0x1a9   :  { %v244_v56 = vpop.f32.mrb[3].mxu0  ;;  %v253_v58 = vadd.f32 %v308_v54, %v161_v47  ;;  %v258_v60 = vmax.f32 %v250_v52, 0.0 }
 0x1aa   :  { %v256_v57 = vmax.f32 %v242_v53, 0.0  ;;  %v245_v59 = vadd.f32 %v244_v56, %v153_v48 }
 0x1ab   :  { %v259_v2 = vmax.f32 %v253_v58, 0.0  ;;  %v262_v5 = vmul.f32 %v258_v60, %v173_v62 }
 0x1ac   :  { %v257_v61 = vmax.f32 %v245_v59, 0.0  ;;  %v260_v63 = vmul.f32 %v256_v57, %v165_v55 }
 0x1ad   :  { %v263_v8 = vmul.f32 %v259_v2, %v177_v4 }
 0x1ae   :  { %v261_v3 = vmul.f32 %v257_v61, %v169_v50 }
 0x1b0   :  { %v264_v6 = vadd.f32 %v261_v3, %v260_v63 }
 0x1b2   :  { %v265_v7 = vadd.f32 %v264_v6, %v262_v5 }
 0x1b4   :  { %v266_v10 = vadd.f32 %v265_v7, %v263_v8 }
 0x1b6   :  { %v267_v11 = vrot.slane %v266_v10, 4 }
 0x1b8   :  { %v268_v12 = vadd.f32 %v267_v11, %v266_v10 }
 0x1ba   :  { %v269_v13 = vrot.slane %v268_v12, 2 }
 0x1bc   :  { %v270_v9 = vadd.f32 %v269_v13, %v268_v12 }
 0x1be   :  { %v271_v14 = vrot.slane %v270_v9, 1 }
 0x1c0   :  { %v272_v16 = vadd.f32 %v271_v14, %v270_v9 }
 0x1c2   :  { %v277_v17 = vadd.f32 %v275_v15, %v272_v16 }
 0x1c4   :  { %278 = vst [vmem:[#allocation5] sm:$0x1] %v277_v17 }
 0x1c5   :  { %378 = shalt.err (!%p375_p12)
}
 0x1c6   :  { %s379_s29 = scalar_lea.hbm %s487_s2, 16 }
 0x1c7   :  { %p380_p13 = scmp.ne.s32.totalorder %s487_s2, %s379_s29  ;;  %p383_p0 = scmp.lt.u32.totalorder %s379_s29, %s487_s2 }
 0x1c9   :  { %p385_p1 = pnand %p383_p0, %p380_p13 }
 0x1cb   :  { %388 = shalt.err (!%p385_p1)
}
 0x1cc   :  { %288 = dma.vmem_to_hbm [thread:$0]  %s286_s24, 16, %s487_s2, [#allocation4]  }
 0x1cd   :  { %391 = dma.done.wait [#allocation4], 16  }
 0x1ce   :  { %392 = vsyncadd [#allocation4], 4294967280 }
 0x1cf   :  { %292 = vsyncpa [#allocation3], 1 }
 0x1d0   :  { %293 = vsyncpa [#allocation4], 1 }

</bundles_post_ra>
